<compile_context>
chip_gen: v5e
topology: v5e:2x2
jax: 0.10.0
libtpu: 0.0.40
codegen_flags: <defaults>
</compile_context>

<pallas_src>
import jax
import jax.numpy as jnp
from jax.experimental import pallas as pl
from jax.experimental.pallas import tpu as pltpu


def _round_up(x, m):
    return ((x + m - 1) // m) * m


def _final_block_kernel(x_ref, w_ref, b_ref, out_ref, acc_ref):
    # x_ref:   (TB, TS, C)  native dtype, channels on the lane axis
    # w_ref:   (C, Npad)    f32, pre-transposed, 1/(H*W) folded in
    # b_ref:   (1, Npad)    f32
    # out_ref: (TB, Npad)   f32
    # acc_ref: (TB, C)      f32 scratch — pooled-sum accumulator
    s = pl.program_id(1)

    @pl.when(s == 0)
    def _():
        acc_ref[...] = jnp.zeros_like(acc_ref)

    # Pool: accumulate the spatial sum in f32 (scale already folded into W).
    acc_ref[...] += jnp.sum(x_ref[...].astype(jnp.float32), axis=1)

    @pl.when(s == pl.num_programs(1) - 1)
    def _():
        pooled = acc_ref[...]                              # (TB, C) f32
        logits = jnp.dot(pooled, w_ref[...],               # weight already [C, Npad]
                         preferred_element_type=jnp.float32)
        out_ref[...] = (logits + b_ref[...]).astype(out_ref.dtype)


def final_block_with_fc(x_nchw, fc_weight, fc_bias, *,
                        max_spatial_tile=2048,
                        vmem_block_budget_bytes=8 * 1024 * 1024):
    """Fused global-avg-pool + flatten + Linear.

    x_nchw:    [B, C, H, W] (kept in its native dtype in HBM)
    fc_weight: [num_classes, C]
    fc_bias:   [num_classes]
    returns:   [B, num_classes] float32 logits
    """
    B, C, H, W = x_nchw.shape
    num_classes = fc_weight.shape[0]
    S = H * W

    # Channels on the lane axis: [B, S, C].
    x_bsc = jnp.transpose(jnp.reshape(x_nchw, (B, C, S)), (0, 2, 1))

    # ---- tile sizes ---------------------------------------------------------
    # Spatial (reduction) tile: multiple of 8 sublanes, balanced chunking.
    s8 = _round_up(S, 8)
    n_s = max(1, pl.cdiv(s8, max_spatial_tile))
    ts = _round_up(pl.cdiv(s8, n_s), 8)
    s_pad = n_s * ts

    # Batch tile: one (TB, TS, C) input block within the per-buffer budget
    # (double-buffered by the pipeline); multiple of 8 for a clean MXU M dim.
    row_bytes = ts * C * x_bsc.dtype.itemsize
    tb = max(8, (vmem_block_budget_bytes // max(row_bytes, 1)) // 8 * 8)
    tb = min(tb, _round_up(B, 8))
    b_pad = _round_up(B, tb)

    # Lane-dense output / MXU N dim.
    n_pad = _round_up(num_classes, 128)

    # ---- padding (zeros are neutral for the pooled *sum*) -------------------
    if (b_pad, s_pad) != (B, S):
        x_bsc = jnp.pad(x_bsc, ((0, b_pad - B), (0, s_pad - S), (0, 0)))

    # Pre-transpose weight to [C, num_classes], fold in the 1/(H*W) pool scale,
    # zero-pad the class axis (padded logits are sliced off below).
    w_t = jnp.transpose(fc_weight.astype(jnp.float32)) / jnp.float32(S)
    w_t = jnp.pad(w_t, ((0, 0), (0, n_pad - num_classes)))
    b_2d = jnp.pad(fc_bias.astype(jnp.float32).reshape(1, num_classes),
                   ((0, 0), (0, n_pad - num_classes)))

    grid = (b_pad // tb, s_pad // ts)

    out = pl.pallas_call(
        _final_block_kernel,
        out_shape=jax.ShapeDtypeStruct((b_pad, n_pad), jnp.float32),
        grid_spec=pltpu.PrefetchScalarGridSpec(
            num_scalar_prefetch=0,
            grid=grid,
            in_specs=[
                pl.BlockSpec((tb, ts, C), lambda i, s: (i, s, 0)),   # x tiles
                pl.BlockSpec((C, n_pad), lambda i, s: (0, 0)),       # W resident
                pl.BlockSpec((1, n_pad), lambda i, s: (0, 0)),       # bias resident
            ],
            out_specs=pl.BlockSpec((tb, n_pad), lambda i, s: (i, 0)),
            scratch_shapes=[pltpu.VMEM((tb, C), jnp.float32)],
        ),
        compiler_params=pltpu.CompilerParams(
            dimension_semantics=("parallel", "arbitrary")),
    )(x_bsc, w_t, b_2d)

    return out[:B, :num_classes]


if __name__ == "__main__":
    # Small deterministic shapes consistent with the module:
    # NCHW input -> AdaptiveAvgPool2d((1,1)) -> flatten -> Linear(C, num_classes).
    B, C, H, W = 2, 4, 16, 16
    num_classes = 10

    key = jax.random.PRNGKey(0)
    kx, kw, kb = jax.random.split(key, 3)

    x = jax.random.normal(kx, (B, C, H, W), dtype=jnp.float32)
    fc_weight = jax.random.normal(kw, (num_classes, C), dtype=jnp.float32) * 0.1
    fc_bias = jax.random.normal(kb, (num_classes,), dtype=jnp.float32) * 0.1

    out = final_block_with_fc(x, fc_weight, fc_bias)
    out = jax.block_until_ready(out)

    # Pure-JAX reference.
    pooled_ref = jnp.mean(x, axis=(2, 3))                  # [B, C]
    ref = pooled_ref @ fc_weight.T + fc_bias[None, :]      # [B, num_classes]
    assert out.shape == (B, num_classes)
    assert jnp.allclose(out, ref, atol=1e-4, rtol=1e-4)

    print("KERNEL_OK")
</pallas_src>

<mosaic_0001>
module attributes {stable_mosaic.version = 11 : i64} {
  func.func @_final_block_kernel(%arg0: i32, %arg1: i32, %arg2: memref<8x256x4xf32, #tpu.memory_space<vmem>>, %arg3: memref<4x128xf32, #tpu.memory_space<vmem>>, %arg4: memref<1x128xf32, #tpu.memory_space<vmem>>, %arg5: memref<8x128xf32, #tpu.memory_space<vmem>>, %arg6: memref<8x4xf32, #tpu.memory_space<vmem>>) attributes {dimension_semantics = [#tpu.dimension_semantics<parallel>, #tpu.dimension_semantics<arbitrary>], iteration_bounds = array<i64: 1, 1>, scalar_prefetch = 0 : i64, scratch_operands = 1 : i64, tpu.core_type = #tpu.core_type<tc>, window_params = [{transform_indices = @transform_0, window_bounds = array<i64: 8, 256, 4>}, {pipeline_mode = #tpu.pipeline_mode<synchronous>, transform_indices = @transform_1, window_bounds = array<i64: 4, 128>}, {pipeline_mode = #tpu.pipeline_mode<synchronous>, transform_indices = @transform_2, window_bounds = array<i64: 1, 128>}, {transform_indices = @transform_3, window_bounds = array<i64: 8, 128>}]} {
    %c0_i32 = arith.constant 0 : i32
    %0 = arith.cmpi eq, %arg1, %c0_i32 : i32
    %1 = arith.extui %0 : i1 to i32
    %c0_i32_0 = arith.constant 0 : i32
    %2 = arith.cmpi ne, %1, %c0_i32_0 : i32
    scf.if %2 {
      %cst_9 = arith.constant 0.000000e+00 : f32
      %11 = vector.broadcast %cst_9 : f32 to vector<8x4xf32>
      %c0_10 = arith.constant 0 : index
      %c0_11 = arith.constant 0 : index
      %12 = vector.load %arg6[%c0_10, %c0_11] : memref<8x4xf32, #tpu.memory_space<vmem>>, vector<8x4xf32>
      tpu.vector_store %arg6[%c0_10, %c0_11], %11 {strides = array<i32>} : memref<8x4xf32, #tpu.memory_space<vmem>>, vector<8x4xf32>,
    } else {
    }
    %c0 = arith.constant 0 : index
    %c0_1 = arith.constant 0 : index
    %3 = vector.load %arg6[%c0, %c0_1] : memref<8x4xf32, #tpu.memory_space<vmem>>, vector<8x4xf32>
    %c0_2 = arith.constant 0 : index
    %c0_3 = arith.constant 0 : index
    %c0_4 = arith.constant 0 : index
    %4 = vector.load %arg2[%c0_2, %c0_3, %c0_4] : memref<8x256x4xf32, #tpu.memory_space<vmem>>, vector<8x256x4xf32>
    %cst = arith.constant dense<0.000000e+00> : vector<8x4xf32>
    %5 = vector.multi_reduction <add>, %4, %cst [1] : vector<8x256x4xf32> to vector<8x4xf32>
    %6 = arith.addf %3, %5 : vector<8x4xf32>
    %c0_5 = arith.constant 0 : index
    %c0_6 = arith.constant 0 : index
    %7 = vector.load %arg6[%c0_5, %c0_6] : memref<8x4xf32, #tpu.memory_space<vmem>>, vector<8x4xf32>
    tpu.vector_store %arg6[%c0_5, %c0_6], %6 {strides = array<i32>} : memref<8x4xf32, #tpu.memory_space<vmem>>, vector<8x4xf32>,
    %c0_i32_7 = arith.constant 0 : i32
    %8 = arith.cmpi eq, %arg1, %c0_i32_7 : i32
    %9 = arith.extui %8 : i1 to i32
    %c0_i32_8 = arith.constant 0 : i32
    %10 = arith.cmpi ne, %9, %c0_i32_8 : i32
    scf.if %10 {
      %c0_9 = arith.constant 0 : index
      %c0_10 = arith.constant 0 : index
      %11 = vector.load %arg6[%c0_9, %c0_10] : memref<8x4xf32, #tpu.memory_space<vmem>>, vector<8x4xf32>
      %c0_11 = arith.constant 0 : index
      %c0_12 = arith.constant 0 : index
      %12 = vector.load %arg3[%c0_11, %c0_12] : memref<4x128xf32, #tpu.memory_space<vmem>>, vector<4x128xf32>
      %cst_13 = arith.constant dense<0.000000e+00> : vector<8x128xf32>
      %13 = tpu.matmul %11, %12, %cst_13 {dimension_numbers = #tpu.dot_dimension_numbers<[1], [0], [0], [1], [0, 0, 1, 1], [], []>} : vector<8x4xf32>, vector<4x128xf32>, vector<8x128xf32> -> vector<8x128xf32>
      %c0_14 = arith.constant 0 : index
      %c0_15 = arith.constant 0 : index
      %14 = vector.load %arg4[%c0_14, %c0_15] : memref<1x128xf32, #tpu.memory_space<vmem>>, vector<1x128xf32>
      %15 = vector.broadcast %14 : vector<1x128xf32> to vector<8x128xf32>
      %16 = arith.addf %13, %15 : vector<8x128xf32>
      %c0_16 = arith.constant 0 : index
      %c0_17 = arith.constant 0 : index
      %17 = vector.load %arg5[%c0_16, %c0_17] : memref<8x128xf32, #tpu.memory_space<vmem>>, vector<8x128xf32>
      tpu.vector_store %arg5[%c0_16, %c0_17], %16 {strides = array<i32>} : memref<8x128xf32, #tpu.memory_space<vmem>>, vector<8x128xf32>,
    } else {
    }
    return
  }
  func.func @transform_0(%arg0: i32, %arg1: i32) -> (i32, i32, i32) {
    %c0_i32 = arith.constant 0 : i32
    %c0_i32_0 = arith.constant 0 : i32
    return %arg0, %arg1, %c0_i32 : i32, i32, i32
  }
  func.func @transform_1(%arg0: i32, %arg1: i32) -> (i32, i32) {
    %c0_i32 = arith.constant 0 : i32
    %c0_i32_0 = arith.constant 0 : i32
    %c0_i32_1 = arith.constant 0 : i32
    return %c0_i32, %c0_i32_0 : i32, i32
  }
  func.func @transform_2(%arg0: i32, %arg1: i32) -> (i32, i32) {
    %c0_i32 = arith.constant 0 : i32
    %c0_i32_0 = arith.constant 0 : i32
    %c0_i32_1 = arith.constant 0 : i32
    return %c0_i32, %c0_i32_0 : i32, i32
  }
  func.func @transform_3(%arg0: i32, %arg1: i32) -> (i32, i32) {
    %c0_i32 = arith.constant 0 : i32
    %c0_i32_0 = arith.constant 0 : i32
    return %arg0, %c0_i32 : i32, i32
  }
}

</mosaic_0001>

<bundles_post_ra>
// kernel: tpu_custom_call.1
= control target key start
LH: loop header
LB: loop body
LE: loop exit
PB: predicated region body
PF: predicated region fallthrough
CT: control target
= control target key end

     0   :  { %8 = vsyncpa [#allocation4], 0  ;;  %vm19_vm0 = vcmask 31744   ;;  %v940_v0 = vmov 0.0   ;;  %vm868_vm1 = vcmask 1043456   ;;  %vm839_vm2 = vcmask 1041409   ;;  %s2151_s0 = inlined_call_operand.vmem [shape: f32[8,256,4], index: 0, kind: input, shape index: {}]   ;;  %s2152_s1 = inlined_call_operand.vmem [shape: f32[4,128], index: 1, kind: input, shape index: {}]   ;;  %s2153_s2 = inlined_call_operand.vmem [shape: f32[1,128], index: 2, kind: input, shape index: {}]   ;;  %s2154_s3 = inlined_call_operand.hbm [shape: f32[8,128], index: 3, kind: output, shape index: {}]  }
   0x1   :  { %20 = vst.msk [vmem:[#allocation2] sm:$0xff] %vm19_vm0, %v940_v0  ;;  %v22_v1 = vld [vmem:[%s2151_s0] sm:$0xff]  ;;  %v23_v2 = vld [vmem:[%s2151_s0 + $0x8] sm:$0xff]  ;;  %v24_v6 = vld [vmem:[%s2151_s0 + $0x10] sm:$0xff]  ;;  %vm841_vm3 = vcmask 1042434   ;;  %vm843_vm4 = vcmask 1043459  }
   0x2   :  { %v54_v3 = vld [vmem:[%s2151_s0 + $0x100] sm:$0xff]  ;;  %v55_v4 = vld [vmem:[%s2151_s0 + $0x108] sm:$0xff]  ;;  %v56_v7 = vld [vmem:[%s2151_s0 + $0x110] sm:$0xff]  ;;  %v279_v9 = vsel %vm19_vm0, %v22_v1, 0.0  ;;  %v280_v10 = vsel %vm19_vm0, %v23_v2, 0.0  ;;  %v282_v17 = vsel %vm19_vm0, %v24_v6, 0.0 }
   0x3   :  { %v86_v5 = vld [vmem:[%s2151_s0 + $0x200] sm:$0xff]  ;;  %v87_v8 = vld [vmem:[%s2151_s0 + $0x208] sm:$0xff]  ;;  %v348_v11 = vsel %vm19_vm0, %v54_v3, 0.0  ;;  %v25_v12 = vld [vmem:[%s2151_s0 + $0x18] sm:$0xff]  ;;  %v281_v14 = vadd.f32 %v280_v10, %v279_v9  ;;  %v349_v15 = vsel %vm19_vm0, %v55_v4, 0.0  ;;  %v351_v19 = vsel %vm19_vm0, %v56_v7, 0.0 }
   0x4   :  { %v57_v13 = vld [vmem:[%s2151_s0 + $0x118] sm:$0xff]  ;;  %v417_v16 = vsel %vm19_vm0, %v86_v5, 0.0  ;;  %v350_v18 = vadd.f32 %v349_v15, %v348_v11  ;;  %v418_v20 = vsel %vm19_vm0, %v87_v8, 0.0  ;;  %v26_v21 = vld [vmem:[%s2151_s0 + $0x20] sm:$0xff]  ;;  %v88_v23 = vld [vmem:[%s2151_s0 + $0x210] sm:$0xff]  ;;  %v284_v25 = vsel %vm19_vm0, %v25_v12, 0.0 }
   0x5   :  { %v58_v22 = vld [vmem:[%s2151_s0 + $0x120] sm:$0xff]  ;;  %v283_v24 = vadd.f32 %v282_v17, %v281_v14  ;;  %v353_v27 = vsel %vm19_vm0, %v57_v13, 0.0  ;;  %v27_v28 = vld [vmem:[%s2151_s0 + $0x28] sm:$0xff]  ;;  %v419_v31 = vadd.f32 %v418_v20, %v417_v16  ;;  %v286_v34 = vsel %vm19_vm0, %v26_v21, 0.0  ;;  %v28_v38 = vld [vmem:[%s2151_s0 + $0x30] sm:$0xff]  ;;  %s941_s13 = smov [#allocation3]  }
   0x6   :  { %v352_v26 = vadd.f32 %v351_v19, %v350_v18  ;;  %v59_v29 = vld [vmem:[%s2151_s0 + $0x128] sm:$0xff]  ;;  %v118_v32 = vld [vmem:[%s2151_s0 + $0x300] sm:$0xff]  ;;  %v355_v36 = vsel %vm19_vm0, %v58_v22, 0.0  ;;  %v420_v37 = vsel %vm19_vm0, %v88_v23, 0.0  ;;  %v60_v39 = vld [vmem:[%s2151_s0 + $0x130] sm:$0xff]  ;;  %v288_v42 = vsel %vm19_vm0, %v27_v28, 0.0 }
   0x7   :  { %v285_v30 = vadd.f32 %v284_v25, %v283_v24  ;;  %v119_v33 = vld [vmem:[%s2151_s0 + $0x308] sm:$0xff]  ;;  %v89_v40 = vld [vmem:[%s2151_s0 + $0x218] sm:$0xff]  ;;  %v357_v44 = vsel %vm19_vm0, %v59_v29, 0.0  ;;  %v421_v48 = vadd.f32 %v420_v37, %v419_v31  ;;  %v486_v49 = vsel %vm19_vm0, %v118_v32, 0.0  ;;  %v120_v51 = vld [vmem:[%s2151_s0 + $0x310] sm:$0xff]  ;;  %s898_s14 = sshll.u32 %s941_s13, 4  ;;  %s899_s14 = int_to_ptr.vmem [resolvable:$true] %s898_s14 }
   0x8   :  { %v354_v35 = vadd.f32 %v353_v27, %v352_v26  ;;  %v29_v45 = vld [vmem:[%s2151_s0 + $0x38] sm:$0xff]  ;;  %v487_v50 = vsel %vm19_vm0, %v119_v33, 0.0  ;;  %v290_v52 = vsel %vm19_vm0, %v28_v38, 0.0  ;;  %v359_v54 = vsel %vm19_vm0, %v60_v39, 0.0  ;;  %v30_v56 = vld [vmem:[%s2151_s0 + $0x40] sm:$0xff]  ;;  %v31_v59 = vld [vmem:[%s2151_s0 + $0x48] sm:$0xff] }
   0x9   :  { %v287_v41 = vadd.f32 %v286_v34, %v285_v30  ;;  %v61_v46 = vld [vmem:[%s2151_s0 + $0x138] sm:$0xff]  ;;  %v422_v55 = vsel %vm19_vm0, %v89_v40, 0.0  ;;  %v90_v57 = vld [vmem:[%s2151_s0 + $0x220] sm:$0xff]  ;;  %v292_v60 = vsel %vm19_vm0, %v29_v45, 0.0  ;;  %v488_v63 = vadd.f32 %v487_v50, %v486_v49  ;;  %v32_v0 = vld [vmem:[%s2151_s0 + $0x50] sm:$0xff]  ;;  %s900_s17 = sshll.u32 %s2154_s3, 4  ;;  %s901_s17 = int_to_ptr.hbm [resolvable:$true] %s900_s17 }
   0xa   :  { %v356_v43 = vadd.f32 %v355_v36, %v354_v35  ;;  %v361_v62 = vsel %vm19_vm0, %v61_v46, 0.0  ;;  %v62_v1 = vld [vmem:[%s2151_s0 + $0x140] sm:$0xff]  ;;  %v423_v3 = vadd.f32 %v422_v55, %v421_v48  ;;  %v489_v4 = vsel %vm19_vm0, %v120_v51, 0.0  ;;  %v121_v5 = vld [vmem:[%s2151_s0 + $0x318] sm:$0xff]  ;;  %v91_v8 = vld [vmem:[%s2151_s0 + $0x228] sm:$0xff] }
   0xb   :  { %v289_v47 = vadd.f32 %v288_v42, %v287_v41  ;;  %v294_v6 = vsel %vm19_vm0, %v30_v56, 0.0  ;;  %v424_v7 = vsel %vm19_vm0, %v90_v57, 0.0  ;;  %v296_v10 = vsel %vm19_vm0, %v31_v59, 0.0  ;;  %v33_v12 = vld [vmem:[%s2151_s0 + $0x58] sm:$0xff]  ;;  %v63_v19 = vld [vmem:[%s2151_s0 + $0x148] sm:$0xff]  ;;  %v122_v20 = vld [vmem:[%s2151_s0 + $0x320] sm:$0xff] }
   0xc   :  { %v358_v53 = vadd.f32 %v357_v44, %v356_v43  ;;  %v298_v13 = vsel %vm19_vm0, %v32_v0, 0.0  ;;  %v363_v14 = vsel %vm19_vm0, %v62_v1, 0.0  ;;  %v490_v15 = vadd.f32 %v489_v4, %v488_v63  ;;  %v92_v22 = vld [vmem:[%s2151_s0 + $0x230] sm:$0xff]  ;;  %v34_v26 = vld [vmem:[%s2151_s0 + $0x60] sm:$0xff]  ;;  %v123_v32 = vld [vmem:[%s2151_s0 + $0x328] sm:$0xff] }
   0xd   :  { %v291_v58 = vadd.f32 %v290_v52, %v289_v47  ;;  %v425_v17 = vadd.f32 %v424_v7, %v423_v3  ;;  %v491_v18 = vsel %vm19_vm0, %v121_v5, 0.0  ;;  %v426_v21 = vsel %vm19_vm0, %v91_v8, 0.0  ;;  %v64_v28 = vld [vmem:[%s2151_s0 + $0x150] sm:$0xff]  ;;  %v93_v35 = vld [vmem:[%s2151_s0 + $0x238] sm:$0xff]  ;;  %v35_v38 = vld [vmem:[%s2151_s0 + $0x68] sm:$0xff] }
   0xe   :  { %v360_v61 = vadd.f32 %v359_v54, %v358_v53  ;;  %v300_v24 = vsel %vm19_vm0, %v33_v12, 0.0  ;;  %v492_v27 = vadd.f32 %v491_v18, %v490_v15  ;;  %v365_v29 = vsel %vm19_vm0, %v63_v19, 0.0  ;;  %v65_v41 = vld [vmem:[%s2151_s0 + $0x158] sm:$0xff]  ;;  %v124_v44 = vld [vmem:[%s2151_s0 + $0x330] sm:$0xff]  ;;  %v94_v47 = vld [vmem:[%s2151_s0 + $0x240] sm:$0xff] }
   0xf   :  { %v293_v2 = vadd.f32 %v292_v60, %v291_v58  ;;  %v427_v30 = vadd.f32 %v426_v21, %v425_v17  ;;  %v493_v31 = vsel %vm19_vm0, %v122_v20, 0.0  ;;  %v428_v34 = vsel %vm19_vm0, %v92_v22, 0.0  ;;  %v36_v50 = vld [vmem:[%s2151_s0 + $0x70] sm:$0xff]  ;;  %v66_v53 = vld [vmem:[%s2151_s0 + $0x160] sm:$0xff]  ;;  %v125_v56 = vld [vmem:[%s2151_s0 + $0x338] sm:$0xff] }
  0x10   :  { %v362_v11 = vadd.f32 %v361_v62, %v360_v61  ;;  %v302_v36 = vsel %vm19_vm0, %v34_v26, 0.0  ;;  %v367_v39 = vsel %vm19_vm0, %v64_v28, 0.0  ;;  %v494_v40 = vadd.f32 %v493_v31, %v492_v27  ;;  %v95_v59 = vld [vmem:[%s2151_s0 + $0x248] sm:$0xff]  ;;  %v37_v62 = vld [vmem:[%s2151_s0 + $0x78] sm:$0xff]  ;;  %v126_v4 = vld [vmem:[%s2151_s0 + $0x340] sm:$0xff] }
  0x11   :  { %v295_v9 = vadd.f32 %v294_v6, %v293_v2  ;;  %v429_v42 = vadd.f32 %v428_v34, %v427_v30  ;;  %v495_v43 = vsel %vm19_vm0, %v123_v32, 0.0  ;;  %v430_v46 = vsel %vm19_vm0, %v93_v35, 0.0  ;;  %v67_v1 = vld [vmem:[%s2151_s0 + $0x168] sm:$0xff]  ;;  %v96_v7 = vld [vmem:[%s2151_s0 + $0x250] sm:$0xff]  ;;  %v97_v19 = vld [vmem:[%s2151_s0 + $0x258] sm:$0xff] }
  0x12   :  { %v364_v25 = vadd.f32 %v363_v14, %v362_v11  ;;  %v304_v48 = vsel %vm19_vm0, %v35_v38, 0.0  ;;  %v369_v51 = vsel %vm19_vm0, %v65_v41, 0.0  ;;  %v496_v52 = vadd.f32 %v495_v43, %v494_v40  ;;  %v39_v22 = vld [vmem:[%s2151_s0 + $0x88] sm:$0xff]  ;;  %v128_v28 = vld [vmem:[%s2151_s0 + $0x350] sm:$0xff]  ;;  %v98_v31 = vld [vmem:[%s2151_s0 + $0x260] sm:$0xff] }
  0x13   :  { %v297_v16 = vadd.f32 %v296_v10, %v295_v9  ;;  %v431_v54 = vadd.f32 %v430_v46, %v429_v42  ;;  %v497_v55 = vsel %vm19_vm0, %v124_v44, 0.0  ;;  %v432_v58 = vsel %vm19_vm0, %v94_v47, 0.0  ;;  %v38_v10 = vld [vmem:[%s2151_s0 + $0x80] sm:$0xff]  ;;  %v40_v34 = vld [vmem:[%s2151_s0 + $0x90] sm:$0xff]  ;;  %v129_v40 = vld [vmem:[%s2151_s0 + $0x358] sm:$0xff] }
  0x14   :  { %v366_v37 = vadd.f32 %v365_v29, %v364_v25  ;;  %v306_v60 = vsel %vm19_vm0, %v36_v50, 0.0  ;;  %v371_v63 = vsel %vm19_vm0, %v66_v53, 0.0  ;;  %v498_v0 = vadd.f32 %v497_v55, %v496_v52  ;;  %v69_v25 = vld [vmem:[%s2151_s0 + $0x178] sm:$0xff]  ;;  %v99_v44 = vld [vmem:[%s2151_s0 + $0x268] sm:$0xff]  ;;  %v42_v47 = vld [vmem:[%s2151_s0 + $0xa0] sm:$0xff] }
  0x15   :  { %v299_v23 = vadd.f32 %v298_v13, %v297_v16  ;;  %v433_v2 = vadd.f32 %v432_v58, %v431_v54  ;;  %v499_v3 = vsel %vm19_vm0, %v125_v56, 0.0  ;;  %v434_v6 = vsel %vm19_vm0, %v95_v59, 0.0  ;;  %v68_v13 = vld [vmem:[%s2151_s0 + $0x170] sm:$0xff]  ;;  %v127_v16 = vld [vmem:[%s2151_s0 + $0x348] sm:$0xff]  ;;  %v41_v43 = vld [vmem:[%s2151_s0 + $0x98] sm:$0xff] }
  0x16   :  { %v368_v49 = vadd.f32 %v367_v39, %v366_v37  ;;  %v308_v8 = vsel %vm19_vm0, %v37_v62, 0.0  ;;  %v373_v11 = vsel %vm19_vm0, %v67_v1, 0.0  ;;  %v500_v12 = vadd.f32 %v499_v3, %v498_v0  ;;  %v70_v37 = vld [vmem:[%s2151_s0 + $0x180] sm:$0xff]  ;;  %v45_v52 = vld [vmem:[%s2151_s0 + $0xb8] sm:$0xff]  ;;  %v71_v53 = vld [vmem:[%s2151_s0 + $0x188] sm:$0xff] }
  0x17   :  { %v301_v33 = vadd.f32 %v300_v24, %v299_v23  ;;  %v435_v14 = vadd.f32 %v434_v6, %v433_v2  ;;  %v501_v15 = vsel %vm19_vm0, %v126_v4, 0.0  ;;  %v436_v18 = vsel %vm19_vm0, %v96_v7, 0.0  ;;  %v46_v56 = vld [vmem:[%s2151_s0 + $0xc0] sm:$0xff]  ;;  %v49_v62 = vld [vmem:[%s2151_s0 + $0xd8] sm:$0xff] }
  0x18   :  { %v370_v61 = vadd.f32 %v369_v51, %v368_v49  ;;  %v310_v20 = vsel %vm19_vm0, %v38_v10, 0.0  ;;  %v375_v23 = vsel %vm19_vm0, %v68_v13, 0.0  ;;  %v502_v24 = vadd.f32 %v501_v15, %v500_v12  ;;  %v44_v51 = vld [vmem:[%s2151_s0 + $0xb0] sm:$0xff]  ;;  %v130_v58 = vld [vmem:[%s2151_s0 + $0x360] sm:$0xff]  ;;  %v151_v12 = vld [vmem:[%s2151_s0 + $0x408] sm:$0xff] }
  0x19   :  { %v303_v45 = vadd.f32 %v302_v36, %v301_v33  ;;  %v437_v26 = vadd.f32 %v436_v18, %v435_v14  ;;  %v503_v27 = vsel %vm19_vm0, %v127_v16, 0.0  ;;  %v438_v30 = vsel %vm19_vm0, %v97_v19, 0.0  ;;  %v50_v4 = vld [vmem:[%s2151_s0 + $0xe0] sm:$0xff]  ;;  %v152_v13 = vld [vmem:[%s2151_s0 + $0x410] sm:$0xff]  ;;  %v131_v19 = vld [vmem:[%s2151_s0 + $0x368] sm:$0xff] }
  0x1a   :  { %v372_v9 = vadd.f32 %v371_v63, %v370_v61  ;;  %v312_v32 = vsel %vm19_vm0, %v39_v22, 0.0  ;;  %v377_v35 = vsel %vm19_vm0, %v69_v25, 0.0  ;;  %v504_v36 = vadd.f32 %v503_v27, %v502_v24  ;;  %v48_v61 = vld [vmem:[%s2151_s0 + $0xd0] sm:$0xff]  ;;  %v150_v6 = vld [vmem:[%s2151_s0 + $0x400] sm:$0xff]  ;;  %v53_v24 = vld [vmem:[%s2151_s0 + $0xf8] sm:$0xff] }
  0x1b   :  { %v305_v57 = vadd.f32 %v304_v48, %v303_v45  ;;  %v439_v38 = vadd.f32 %v438_v30, %v437_v26  ;;  %v505_v39 = vsel %vm19_vm0, %v128_v28, 0.0  ;;  %v440_v42 = vsel %vm19_vm0, %v98_v31, 0.0  ;;  %v43_v48 = vld [vmem:[%s2151_s0 + $0xa8] sm:$0xff]  ;;  %v100_v63 = vld [vmem:[%s2151_s0 + $0x270] sm:$0xff]  ;;  %v101_v25 = vld [vmem:[%s2151_s0 + $0x278] sm:$0xff] }
  0x1c   :  { %v374_v21 = vadd.f32 %v373_v11, %v372_v9  ;;  %v314_v45 = vsel %vm19_vm0, %v40_v34, 0.0  ;;  %v379_v49 = vsel %vm19_vm0, %v70_v37, 0.0  ;;  %v506_v50 = vadd.f32 %v505_v39, %v504_v36  ;;  %v72_v11 = vld [vmem:[%s2151_s0 + $0x190] sm:$0xff]  ;;  %v153_v26 = vld [vmem:[%s2151_s0 + $0x418] sm:$0xff]  ;;  %v102_v31 = vld [vmem:[%s2151_s0 + $0x280] sm:$0xff] }
  0x1d   :  { %v307_v5 = vadd.f32 %v306_v60, %v305_v57  ;;  %v441_v54 = vadd.f32 %v440_v42, %v439_v38  ;;  %v507_v55 = vsel %vm19_vm0, %v129_v40, 0.0  ;;  %v47_v57 = vld [vmem:[%s2151_s0 + $0xc8] sm:$0xff]  ;;  %v442_v60 = vsel %vm19_vm0, %v99_v44, 0.0  ;;  %v52_v18 = vld [vmem:[%s2151_s0 + $0xf0] sm:$0xff]  ;;  %v73_v37 = vld [vmem:[%s2151_s0 + $0x198] sm:$0xff] }
  0x1e   :  { %v376_v33 = vadd.f32 %v375_v23, %v374_v21  ;;  %v316_v0 = vsel %vm19_vm0, %v41_v43, 0.0  ;;  %v318_v1 = vsel %vm19_vm0, %v42_v47, 0.0  ;;  %v1250_v2 = vsel %vm19_vm0, %v43_v48, 0.0  ;;  %v104_v38 = vld [vmem:[%s2151_s0 + $0x290] sm:$0xff]  ;;  %v154_v39 = vld [vmem:[%s2151_s0 + $0x420] sm:$0xff] }
  0x1f   :  { %v309_v17 = vadd.f32 %v308_v8, %v307_v5  ;;  %v51_v5 = vld [vmem:[%s2151_s0 + $0xe8] sm:$0xff]  ;;  %v1262_v7 = vsel %vm19_vm0, %v44_v51, 0.0  ;;  %v1265_v8 = vsel %vm19_vm0, %v45_v52, 0.0  ;;  %v381_v9 = vsel %vm19_vm0, %v71_v53, 0.0  ;;  %v132_v44 = vld [vmem:[%s2151_s0 + $0x370] sm:$0xff]  ;;  %v134_v51 = vld [vmem:[%s2151_s0 + $0x380] sm:$0xff] }
  0x20   :  { %v378_v46 = vadd.f32 %v377_v35, %v376_v33  ;;  %v508_v10 = vadd.f32 %v507_v55, %v506_v50  ;;  %v1278_v14 = vsel %vm19_vm0, %v46_v56, 0.0  ;;  %v1281_v15 = vsel %vm19_vm0, %v47_v57, 0.0  ;;  %v105_v50 = vld [vmem:[%s2151_s0 + $0x298] sm:$0xff]  ;;  %v155_v52 = vld [vmem:[%s2151_s0 + $0x428] sm:$0xff]  ;;  %v74_v57 = vld [vmem:[%s2151_s0 + $0x1a0] sm:$0xff] }
  0x21   :  { %v311_v29 = vadd.f32 %v310_v20, %v309_v17  ;;  %v443_v16 = vadd.f32 %v442_v60, %v441_v54  ;;  %v509_v17 = vsel %vm19_vm0, %v130_v58, 0.0  ;;  %v1291_v21 = vsel %vm19_vm0, %v48_v61, 0.0  ;;  %v135_v58 = vld [vmem:[%s2151_s0 + $0x388] sm:$0xff] }
  0x22   :  { %v380_v3 = vadd.f32 %v379_v49, %v378_v46  ;;  %v1294_v22 = vsel %vm19_vm0, %v49_v62, 0.0  ;;  %v444_v23 = vsel %vm19_vm0, %v100_v63, 0.0  ;;  %v1307_v27 = vsel %vm19_vm0, %v50_v4, 0.0  ;;  %v106_v63 = vld [vmem:[%s2151_s0 + $0x2a0] sm:$0xff] }
  0x23   :  { %v313_v41 = vadd.f32 %v312_v32, %v311_v29  ;;  %v1310_v28 = vsel %vm19_vm0, %v51_v5, 0.0  ;;  %v555_v30 = vsel %vm19_vm0, %v150_v6, 0.0  ;;  %v103_v32 = vld [vmem:[%s2151_s0 + $0x288] sm:$0xff]  ;;  %v383_v33 = vsel %vm19_vm0, %v72_v11, 0.0 }
  0x24   :  { %v382_v29 = vadd.f32 %v381_v9, %v380_v3  ;;  %v510_v34 = vadd.f32 %v509_v17, %v508_v10  ;;  %v556_v35 = vsel %vm19_vm0, %v151_v12, 0.0  ;;  %v558_v36 = vsel %vm19_vm0, %v152_v13, 0.0  ;;  %v75_v9 = vld [vmem:[%s2151_s0 + $0x1a8] sm:$0xff]  ;;  %v137_v10 = vld [vmem:[%s2151_s0 + $0x398] sm:$0xff]  ;;  %v76_v17 = vld [vmem:[%s2151_s0 + $0x1b0] sm:$0xff] }
  0x25   :  { %v315_v59 = vadd.f32 %v314_v45, %v313_v41  ;;  %v1332_v40 = vsel %vm19_vm0, %v52_v18, 0.0  ;;  %v445_v41 = vadd.f32 %v444_v23, %v443_v16  ;;  %v511_v42 = vsel %vm19_vm0, %v131_v19, 0.0  ;;  %v133_v45 = vld [vmem:[%s2151_s0 + $0x378] sm:$0xff] }
  0x26   :  { %v557_v43 = vadd.f32 %v556_v35, %v555_v30  ;;  %v1342_v47 = vsel %vm19_vm0, %v53_v24, 0.0  ;;  %v446_v48 = vsel %vm19_vm0, %v101_v25, 0.0  ;;  %v560_v49 = vsel %vm19_vm0, %v153_v26, 0.0  ;;  %v77_v18 = vld [vmem:[%s2151_s0 + $0x1b8] sm:$0xff]  ;;  %v78_v25 = vld [vmem:[%s2151_s0 + $0x1c0] sm:$0xff]  ;;  %v79_v26 = vld [vmem:[%s2151_s0 + $0x1c8] sm:$0xff] }
  0x27   :  { %v317_v20 = vadd.f32 %v316_v0, %v315_v59  ;;  %v384_v53 = vadd.f32 %v383_v33, %v382_v29  ;;  %v448_v54 = vsel %vm19_vm0, %v102_v31, 0.0  ;;  %v1357_v55 = vsel %vm19_vm0, %v103_v32, 0.0  ;;  %v136_v0 = vld [vmem:[%s2151_s0 + $0x390] sm:$0xff]  ;;  %v158_v35 = vld [vmem:[%s2151_s0 + $0x440] sm:$0xff] }
  0x28   :  { %v559_v56 = vadd.f32 %v558_v36, %v557_v43  ;;  %v385_v59 = vsel %vm19_vm0, %v73_v37, 0.0  ;;  %v1367_v60 = vsel %vm19_vm0, %v104_v38, 0.0  ;;  %v512_v61 = vadd.f32 %v511_v42, %v510_v34  ;;  %v80_v33 = vld [vmem:[%s2151_s0 + $0x1d0] sm:$0xff]  ;;  %v81_v34 = vld [vmem:[%s2151_s0 + $0x1d8] sm:$0xff]  ;;  %v83_v42 = vld [vmem:[%s2151_s0 + $0x1e8] sm:$0xff] }
  0x29   :  { %v319_v46 = vadd.f32 %v318_v1, %v317_v20  ;;  %v562_v62 = vsel %vm19_vm0, %v154_v39, 0.0  ;;  %v156_v1 = vld [vmem:[%s2151_s0 + $0x430] sm:$0xff]  ;;  %v447_v3 = vadd.f32 %v446_v48, %v445_v41  ;;  %v513_v4 = vsel %vm19_vm0, %v132_v44, 0.0  ;;  %v82_v41 = vld [vmem:[%s2151_s0 + $0x1e0] sm:$0xff] }
  0x2a   :  { %v515_v5 = vsel %vm19_vm0, %v133_v45, 0.0  ;;  %v561_v6 = vadd.f32 %v560_v49, %v559_v56  ;;  %v1389_v12 = vsel %vm19_vm0, %v105_v50, 0.0  ;;  %v1392_v13 = vsel %vm19_vm0, %v134_v51, 0.0  ;;  %v84_v48 = vld [vmem:[%s2151_s0 + $0x1f0] sm:$0xff]  ;;  %v85_v49 = vld [vmem:[%s2151_s0 + $0x1f8] sm:$0xff]  ;;  %v159_v50 = vld [vmem:[%s2151_s0 + $0x448] sm:$0xff] }
  0x2b   :  { %v321_v11 = vadd.f32 %v1250_v2, %v319_v46  ;;  %v564_v16 = vsel %vm19_vm0, %v155_v52, 0.0  ;;  %v157_v2 = vld [vmem:[%s2151_s0 + $0x438] sm:$0xff]  ;;  %v386_v19 = vadd.f32 %v385_v59, %v384_v53  ;;  %v387_v20 = vsel %vm19_vm0, %v74_v57, 0.0  ;;  %v108_v56 = vld [vmem:[%s2151_s0 + $0x2b0] sm:$0xff] }
  0x2c   :  { %v1406_v23 = vsel %vm19_vm0, %v135_v58, 0.0  ;;  %v563_v24 = vadd.f32 %v562_v62, %v561_v6  ;;  %v1415_v29 = vsel %vm19_vm0, %v106_v63, 0.0  ;;  %v514_v30 = vadd.f32 %v513_v4, %v512_v61  ;;  %v109_v62 = vld [vmem:[%s2151_s0 + $0x2b8] sm:$0xff]  ;;  %v160_v63 = vld [vmem:[%s2151_s0 + $0x450] sm:$0xff]  ;;  %v110_v6 = vld [vmem:[%s2151_s0 + $0x2c0] sm:$0xff] }
  0x2d   :  { %v1418_v31 = vsel %vm19_vm0, %v136_v0, 0.0  ;;  %v566_v32 = vsel %vm19_vm0, %v156_v1, 0.0  ;;  %v389_v36 = vsel %vm19_vm0, %v75_v9, 0.0  ;;  %v449_v37 = vadd.f32 %v448_v54, %v447_v3  ;;  %v107_v54 = vld [vmem:[%s2151_s0 + $0x2a8] sm:$0xff]  ;;  %v182_v0 = vld [vmem:[%s2151_s0 + $0x500] sm:$0xff] }
  0x2e   :  { %v1432_v38 = vsel %vm19_vm0, %v137_v10, 0.0  ;;  %v565_v39 = vadd.f32 %v564_v16, %v563_v24  ;;  %v323_v43 = vadd.f32 %v1262_v7, %v321_v11  ;;  %v391_v44 = vsel %vm19_vm0, %v76_v17, 0.0  ;;  %v111_v9 = vld [vmem:[%s2151_s0 + $0x2c8] sm:$0xff] }
  0x2f   :  { %v1443_v45 = vsel %vm19_vm0, %v77_v18, 0.0  ;;  %v568_v46 = vsel %vm19_vm0, %v157_v2, 0.0  ;;  %v388_v7 = vadd.f32 %v387_v20, %v386_v19  ;;  %v1456_v51 = vsel %vm19_vm0, %v78_v25, 0.0  ;;  %v183_v18 = vld [vmem:[%s2151_s0 + $0x508] sm:$0xff]  ;;  %v112_v25 = vld [vmem:[%s2151_s0 + $0x2d0] sm:$0xff] }
  0x30   :  { %v1459_v52 = vsel %vm19_vm0, %v79_v26, 0.0  ;;  %v567_v53 = vadd.f32 %v566_v32, %v565_v39  ;;  %v1468_v57 = vsel %vm19_vm0, %v80_v33, 0.0  ;;  %v1471_v58 = vsel %vm19_vm0, %v81_v34, 0.0  ;;  %v113_v34 = vld [vmem:[%s2151_s0 + $0x2d8] sm:$0xff] }
  0x31   :  { %v516_v59 = vadd.f32 %v515_v5, %v514_v30  ;;  %v570_v61 = vsel %vm19_vm0, %v158_v35, 0.0  ;;  %v1484_v1 = vsel %vm19_vm0, %v82_v41, 0.0  ;;  %v1487_v3 = vsel %vm19_vm0, %v83_v42, 0.0  ;;  %v162_v35 = vld [vmem:[%s2151_s0 + $0x460] sm:$0xff] }
  0x32   :  { %v451_v4 = vadd.f32 %v1357_v55, %v449_v37  ;;  %v569_v5 = vadd.f32 %v568_v46, %v567_v53  ;;  %v325_v10 = vadd.f32 %v1265_v8, %v323_v43  ;;  %v1498_v11 = vsel %vm19_vm0, %v84_v48, 0.0  ;;  %v161_v55 = vld [vmem:[%s2151_s0 + $0x458] sm:$0xff]  ;;  %v184_v8 = vld [vmem:[%s2151_s0 + $0x510] sm:$0xff]  ;;  %v114_v42 = vld [vmem:[%s2151_s0 + $0x2e0] sm:$0xff] }
  0x33   :  { %v1501_v16 = vsel %vm19_vm0, %v85_v49, 0.0  ;;  %v572_v17 = vsel %vm19_vm0, %v159_v50, 0.0  ;;  %v390_v2 = vadd.f32 %v389_v36, %v388_v7  ;;  %v1514_v19 = vsel %vm19_vm0, %v107_v54, 0.0  ;;  %v185_v36 = vld [vmem:[%s2151_s0 + $0x518] sm:$0xff]  ;;  %v115_v43 = vld [vmem:[%s2151_s0 + $0x2e8] sm:$0xff]  ;;  %v116_v50 = vld [vmem:[%s2151_s0 + $0x2f0] sm:$0xff] }
  0x34   :  { %v1517_v20 = vsel %vm19_vm0, %v108_v56, 0.0  ;;  %v571_v24 = vadd.f32 %v570_v61, %v569_v5  ;;  %v1523_v26 = vsel %vm19_vm0, %v109_v62, 0.0  ;;  %v518_v30 = vadd.f32 %v1392_v13, %v516_v59  ;;  %v163_v7 = vld [vmem:[%s2151_s0 + $0x468] sm:$0xff]  ;;  %v186_v53 = vld [vmem:[%s2151_s0 + $0x520] sm:$0xff] }
  0x35   :  { %v574_v32 = vsel %vm19_vm0, %v160_v63, 0.0  ;;  %v624_v33 = vsel %vm19_vm0, %v182_v0, 0.0  ;;  %v453_v37 = vadd.f32 %v1367_v60, %v451_v4  ;;  %v1539_v13 = vsel %vm19_vm0, %v110_v6, 0.0  ;;  %v117_v4 = vld [vmem:[%s2151_s0 + $0x2f8] sm:$0xff]  ;;  %v187_v5 = vld [vmem:[%s2151_s0 + $0x528] sm:$0xff] }
  0x36   :  { %v1542_v39 = vsel %vm19_vm0, %v111_v9, 0.0  ;;  %v573_v41 = vadd.f32 %v572_v17, %v571_v24  ;;  %v327_v46 = vadd.f32 %v1278_v14, %v325_v10  ;;  %v576_v48 = vsel %vm19_vm0, %v161_v55, 0.0  ;;  %v138_v17 = vld [vmem:[%s2151_s0 + $0x3a0] sm:$0xff]  ;;  %v139_v55 = vld [vmem:[%s2151_s0 + $0x3a8] sm:$0xff]  ;;  %v140_v24 = vld [vmem:[%s2151_s0 + $0x3b0] sm:$0xff] }
  0x37   :  { %v625_v60 = vsel %vm19_vm0, %v183_v18, 0.0  ;;  %v627_v49 = vsel %vm19_vm0, %v184_v8, 0.0  ;;  %v392_v54 = vadd.f32 %v391_v44, %v390_v2  ;;  %v1564_v14 = vsel %vm19_vm0, %v112_v25, 0.0  ;;  %v164_v44 = vld [vmem:[%s2151_s0 + $0x470] sm:$0xff]  ;;  %v165_v25 = vld [vmem:[%s2151_s0 + $0x478] sm:$0xff] }
  0x38   :  { %v575_v56 = vadd.f32 %v574_v32, %v573_v41  ;;  %v626_v59 = vadd.f32 %v625_v60, %v624_v33  ;;  %v1567_v61 = vsel %vm19_vm0, %v113_v34, 0.0  ;;  %v520_v62 = vadd.f32 %v1406_v23, %v518_v30  ;;  %v188_v30 = vld [vmem:[%s2151_s0 + $0x530] sm:$0xff] }
  0x39   :  { %v578_v63 = vsel %vm19_vm0, %v162_v35, 0.0  ;;  %v629_v0 = vsel %vm19_vm0, %v185_v36, 0.0  ;;  %v455_v6 = vadd.f32 %v1389_v12, %v453_v37  ;;  %v1583_v23 = vsel %vm19_vm0, %v114_v42, 0.0 }
  0x3a   :  { %v577_v9 = vadd.f32 %v576_v48, %v575_v56  ;;  %v628_v10 = vadd.f32 %v627_v49, %v626_v59  ;;  %v1592_v18 = vsel %vm19_vm0, %v115_v43, 0.0  ;;  %v1595_v8 = vsel %vm19_vm0, %v116_v50, 0.0  ;;  %v141_v43 = vld [vmem:[%s2151_s0 + $0x3b8] sm:$0xff]  ;;  %v142_v49 = vld [vmem:[%s2151_s0 + $0x3c0] sm:$0xff]  ;;  %v143_v50 = vld [vmem:[%s2151_s0 + $0x3c8] sm:$0xff] }
  0x3b   :  { %v580_v12 = vsel %vm19_vm0, %v163_v7, 0.0  ;;  %v631_v2 = vsel %vm19_vm0, %v186_v53, 0.0  ;;  %v329_v32 = vadd.f32 %v1281_v15, %v327_v46  ;;  %v394_v33 = vadd.f32 %v1443_v45, %v392_v54  ;;  %v166_v15 = vld [vmem:[%s2151_s0 + $0x480] sm:$0xff]  ;;  %v189_v45 = vld [vmem:[%s2151_s0 + $0x538] sm:$0xff]  ;;  %v144_v56 = vld [vmem:[%s2151_s0 + $0x3d0] sm:$0xff] }
  0x3c   :  { %v579_v34 = vadd.f32 %v578_v63, %v577_v9  ;;  %v630_v35 = vadd.f32 %v629_v0, %v628_v10  ;;  %v1611_v36 = vsel %vm19_vm0, %v117_v4, 0.0  ;;  %v522_v37 = vadd.f32 %v1418_v31, %v520_v62  ;;  %v167_v59 = vld [vmem:[%s2151_s0 + $0x488] sm:$0xff]  ;;  %v190_v62 = vld [vmem:[%s2151_s0 + $0x540] sm:$0xff] }
  0x3d   :  { %v582_v41 = vsel %vm19_vm0, %v164_v44, 0.0  ;;  %v633_v42 = vsel %vm19_vm0, %v187_v5, 0.0  ;;  %v457_v46 = vadd.f32 %v1415_v29, %v455_v6  ;;  %v525_v31 = vsel %vm19_vm0, %v138_v17, 0.0  ;;  %v168_v17 = vld [vmem:[%s2151_s0 + $0x490] sm:$0xff] }
  0x3e   :  { %v581_v48 = vadd.f32 %v580_v12, %v579_v34  ;;  %v632_v60 = vadd.f32 %v631_v2, %v630_v35  ;;  %v527_v7 = vsel %vm19_vm0, %v139_v55, 0.0  ;;  %v1635_v53 = vsel %vm19_vm0, %v140_v24, 0.0  ;;  %v145_v24 = vld [vmem:[%s2151_s0 + $0x3d8] sm:$0xff]  ;;  %v192_v35 = vld [vmem:[%s2151_s0 + $0x550] sm:$0xff] }
  0x3f   :  { %v584_v54 = vsel %vm19_vm0, %v165_v25, 0.0  ;;  %v635_v29 = vsel %vm19_vm0, %v188_v30, 0.0  ;;  %v331_v63 = vadd.f32 %v1291_v21, %v329_v32  ;;  %v396_v0 = vadd.f32 %v1456_v51, %v394_v33  ;;  %v191_v21 = vld [vmem:[%s2151_s0 + $0x548] sm:$0xff]  ;;  %v214_v51 = vld [vmem:[%s2151_s0 + $0x600] sm:$0xff]  ;;  %v169_v34 = vld [vmem:[%s2151_s0 + $0x498] sm:$0xff] }
  0x40   :  { %v583_v4 = vadd.f32 %v582_v41, %v581_v48  ;;  %v634_v44 = vadd.f32 %v633_v42, %v632_v60  ;;  %v524_v5 = vadd.f32 %v1432_v38, %v522_v37  ;;  %v1652_v6 = vsel %vm19_vm0, %v141_v43, 0.0  ;;  %v215_v25 = vld [vmem:[%s2151_s0 + $0x608] sm:$0xff]  ;;  %v216_v37 = vld [vmem:[%s2151_s0 + $0x610] sm:$0xff] }
  0x41   :  { %v586_v9 = vsel %vm19_vm0, %v166_v15, 0.0  ;;  %v637_v10 = vsel %vm19_vm0, %v189_v45, 0.0  ;;  %v459_v38 = vadd.f32 %v1514_v19, %v457_v46  ;;  %v1667_v55 = vsel %vm19_vm0, %v142_v49, 0.0  ;;  %v217_v45 = vld [vmem:[%s2151_s0 + $0x618] sm:$0xff] }
  0x42   :  { %v585_v12 = vadd.f32 %v584_v54, %v583_v4  ;;  %v636_v2 = vadd.f32 %v635_v29, %v634_v44  ;;  %v1676_v30 = vsel %vm19_vm0, %v143_v50, 0.0  ;;  %v1679_v32 = vsel %vm19_vm0, %v144_v56, 0.0  ;;  %v193_v50 = vld [vmem:[%s2151_s0 + $0x558] sm:$0xff]  ;;  %v218_v56 = vld [vmem:[%s2151_s0 + $0x620] sm:$0xff]  ;;  %v147_v44 = vld [vmem:[%s2151_s0 + $0x3e8] sm:$0xff] }
  0x43   :  { %v588_v19 = vsel %vm19_vm0, %v167_v59, 0.0  ;;  %v639_v33 = vsel %vm19_vm0, %v190_v62, 0.0  ;;  %v333_v41 = vadd.f32 %v1294_v22, %v331_v63  ;;  %v398_v42 = vadd.f32 %v1459_v52, %v396_v0  ;;  %v146_v4 = vld [vmem:[%s2151_s0 + $0x3e0] sm:$0xff] }
  0x44   :  { %v587_v43 = vadd.f32 %v586_v9, %v585_v12  ;;  %v638_v15 = vadd.f32 %v637_v10, %v636_v2  ;;  %v526_v46 = vadd.f32 %v525_v31, %v524_v5  ;;  %v590_v48 = vsel %vm19_vm0, %v168_v17, 0.0  ;;  %v170_v31 = vld [vmem:[%s2151_s0 + $0x4a0] sm:$0xff] }
  0x45   :  { %v641_v60 = vsel %vm19_vm0, %v191_v21, 0.0  ;;  %v693_v49 = vsel %vm19_vm0, %v214_v51, 0.0  ;;  %v1704_v22 = vsel %vm19_vm0, %v145_v24, 0.0  ;;  %v694_v29 = vsel %vm19_vm0, %v215_v25, 0.0  ;;  %v194_v5 = vld [vmem:[%s2151_s0 + $0x560] sm:$0xff]  ;;  %v219_v51 = vld [vmem:[%s2151_s0 + $0x628] sm:$0xff] }
  0x46   :  { %v589_v52 = vadd.f32 %v588_v19, %v587_v43  ;;  %v640_v54 = vadd.f32 %v639_v33, %v638_v15  ;;  %v592_v59 = vsel %vm19_vm0, %v169_v34, 0.0  ;;  %v643_v62 = vsel %vm19_vm0, %v192_v35, 0.0  ;;  %v195_v19 = vld [vmem:[%s2151_s0 + $0x568] sm:$0xff]  ;;  %v148_v15 = vld [vmem:[%s2151_s0 + $0x3f0] sm:$0xff] }
  0x47   :  { %v695_v63 = vadd.f32 %v694_v29, %v693_v49  ;;  %v696_v0 = vsel %vm19_vm0, %v216_v37, 0.0  ;;  %v461_v9 = vadd.f32 %v1517_v20, %v459_v38  ;;  %v698_v21 = vsel %vm19_vm0, %v217_v45, 0.0  ;;  %v171_v35 = vld [vmem:[%s2151_s0 + $0x4a8] sm:$0xff]  ;;  %v149_v45 = vld [vmem:[%s2151_s0 + $0x3f8] sm:$0xff] }
  0x48   :  { %v591_v10 = vadd.f32 %v590_v48, %v589_v52  ;;  %v642_v17 = vadd.f32 %v641_v60, %v640_v54  ;;  %v400_v12 = vadd.f32 %v1468_v57, %v398_v42  ;;  %v528_v2 = vadd.f32 %v527_v7, %v526_v46  ;;  %v220_v57 = vld [vmem:[%s2151_s0 + $0x630] sm:$0xff]  ;;  %v221_v52 = vld [vmem:[%s2151_s0 + $0x638] sm:$0xff] }
  0x49   :  { %v645_v24 = vsel %vm19_vm0, %v193_v50, 0.0  ;;  %v697_v25 = vadd.f32 %v696_v0, %v695_v63  ;;  %v594_v20 = vsel %vm19_vm0, %v170_v31, 0.0  ;;  %v700_v34 = vsel %vm19_vm0, %v218_v56, 0.0  ;;  %v196_v46 = vld [vmem:[%s2151_s0 + $0x570] sm:$0xff] }
  0x4a   :  { %v593_v33 = vadd.f32 %v592_v59, %v591_v10  ;;  %v644_v38 = vadd.f32 %v643_v62, %v642_v17  ;;  %v1744_v7 = vsel %vm19_vm0, %v146_v4, 0.0  ;;  %v1747_v37 = vsel %vm19_vm0, %v147_v44, 0.0  ;;  %v197_v59 = vld [vmem:[%s2151_s0 + $0x578] sm:$0xff]  ;;  %v172_v63 = vld [vmem:[%s2151_s0 + $0x4b0] sm:$0xff]  ;;  %v247_v10 = vld [vmem:[%s2151_s0 + $0x708] sm:$0xff] }
  0x4b   :  { %v647_v42 = vsel %vm19_vm0, %v194_v5, 0.0  ;;  %v699_v43 = vadd.f32 %v698_v21, %v697_v25  ;;  %v335_v48 = vadd.f32 %v1307_v27, %v333_v41  ;;  %v463_v60 = vadd.f32 %v1523_v26, %v461_v9  ;;  %v198_v5 = vld [vmem:[%s2151_s0 + $0x580] sm:$0xff] }
  0x4c   :  { %v646_v49 = vadd.f32 %v645_v24, %v644_v38  ;;  %v702_v50 = vsel %vm19_vm0, %v219_v51, 0.0  ;;  %v402_v54 = vadd.f32 %v1471_v58, %v400_v12  ;;  %v595_v29 = vadd.f32 %v594_v20, %v593_v33  ;;  %v222_v58 = vld [vmem:[%s2151_s0 + $0x640] sm:$0xff]  ;;  %v223_v24 = vld [vmem:[%s2151_s0 + $0x648] sm:$0xff]  ;;  %v249_v20 = vld [vmem:[%s2151_s0 + $0x718] sm:$0xff] }
  0x4d   :  { %v649_v31 = vsel %vm19_vm0, %v195_v19, 0.0  ;;  %v701_v56 = vadd.f32 %v700_v34, %v699_v43  ;;  %v530_v27 = vadd.f32 %v1635_v53, %v528_v2  ;;  %v596_v26 = vsel %vm19_vm0, %v171_v35, 0.0  ;;  %v246_v9 = vld [vmem:[%s2151_s0 + $0x700] sm:$0xff]  ;;  %v199_v2 = vld [vmem:[%s2151_s0 + $0x588] sm:$0xff] }
  0x4e   :  { %v648_v41 = vadd.f32 %v647_v42, %v646_v49  ;;  %v704_v62 = vsel %vm19_vm0, %v220_v57, 0.0  ;;  %v1780_v0 = vsel %vm19_vm0, %v148_v15, 0.0  ;;  %v1783_v4 = vsel %vm19_vm0, %v149_v45, 0.0  ;;  %v224_v42 = vld [vmem:[%s2151_s0 + $0x650] sm:$0xff] }
  0x4f   :  { %v651_v53 = vsel %vm19_vm0, %v196_v46, 0.0  ;;  %v703_v44 = vadd.f32 %v702_v50, %v701_v56  ;;  %v1796_v17 = vadd.f32 %v1310_v28, %v335_v48  ;;  %v465_v21 = vadd.f32 %v1539_v13, %v463_v60  ;;  %v248_v13 = vld [vmem:[%s2151_s0 + $0x710] sm:$0xff]  ;;  %v250_v48 = vld [vmem:[%s2151_s0 + $0x720] sm:$0xff] }
  0x50   :  { %v650_v51 = vadd.f32 %v649_v31, %v648_v41  ;;  %v706_v12 = vsel %vm19_vm0, %v221_v52, 0.0  ;;  %v404_v25 = vadd.f32 %v1484_v1, %v402_v54  ;;  %v597_v19 = vadd.f32 %v596_v26, %v595_v29  ;;  %v173_v1 = vld [vmem:[%s2151_s0 + $0x4b8] sm:$0xff]  ;;  %v200_v46 = vld [vmem:[%s2151_s0 + $0x590] sm:$0xff]  ;;  %v251_v26 = vld [vmem:[%s2151_s0 + $0x728] sm:$0xff] }
  0x51   :  { %v653_v33 = vsel %vm19_vm0, %v197_v59, 0.0  ;;  %v705_v28 = vadd.f32 %v704_v62, %v703_v44  ;;  %v532_v38 = vadd.f32 %v1652_v6, %v530_v27  ;;  %v598_v34 = vsel %vm19_vm0, %v172_v63, 0.0  ;;  %v225_v54 = vld [vmem:[%s2151_s0 + $0x658] sm:$0xff]  ;;  %v226_v44 = vld [vmem:[%s2151_s0 + $0x660] sm:$0xff] }
  0x52   :  { %v652_v35 = vadd.f32 %v651_v53, %v650_v51  ;;  %v708_v57 = vsel %vm19_vm0, %v222_v58, 0.0  ;;  %v655_v43 = vsel %vm19_vm0, %v198_v5, 0.0  ;;  %v762_v45 = vsel %vm19_vm0, %v246_v9, 0.0  ;;  %v201_v27 = vld [vmem:[%s2151_s0 + $0x598] sm:$0xff]  ;;  %v174_v53 = vld [vmem:[%s2151_s0 + $0x4c0] sm:$0xff] }
  0x53   :  { %v707_v15 = vadd.f32 %v706_v12, %v705_v28  ;;  %v763_v6 = vsel %vm19_vm0, %v247_v10, 0.0  ;;  %v657_v49 = vsel %vm19_vm0, %v199_v2, 0.0  ;;  %v710_v50 = vsel %vm19_vm0, %v223_v24, 0.0  ;;  %v202_v12 = vld [vmem:[%s2151_s0 + $0x5a0] sm:$0xff]  ;;  %v252_v2 = vld [vmem:[%s2151_s0 + $0x730] sm:$0xff] }
  0x54   :  { %v654_v60 = vadd.f32 %v653_v33, %v652_v35  ;;  %v764_v52 = vadd.f32 %v763_v6, %v762_v45  ;;  %v599_v29 = vadd.f32 %v598_v34, %v597_v19  ;;  %v765_v56 = vsel %vm19_vm0, %v248_v13, 0.0  ;;  %v203_v35 = vld [vmem:[%s2151_s0 + $0x5a8] sm:$0xff] }
  0x55   :  { %v709_v31 = vadd.f32 %v708_v57, %v707_v15  ;;  %v767_v59 = vsel %vm19_vm0, %v249_v20, 0.0  ;;  %v600_v41 = vsel %vm19_vm0, %v173_v1, 0.0  ;;  %v712_v63 = vsel %vm19_vm0, %v224_v42, 0.0  ;;  %v228_v15 = vld [vmem:[%s2151_s0 + $0x670] sm:$0xff] }
  0x56   :  { %v656_v62 = vadd.f32 %v655_v43, %v654_v60  ;;  %v766_v58 = vadd.f32 %v765_v56, %v764_v52  ;;  %v467_v5 = vadd.f32 %v1542_v39, %v465_v21  ;;  %v659_v9 = vsel %vm19_vm0, %v200_v46, 0.0  ;;  %v227_v39 = vld [vmem:[%s2151_s0 + $0x668] sm:$0xff]  ;;  %v204_v60 = vld [vmem:[%s2151_s0 + $0x5b0] sm:$0xff] }
  0x57   :  { %v711_v10 = vadd.f32 %v710_v50, %v709_v31  ;;  %v769_v51 = vsel %vm19_vm0, %v250_v48, 0.0  ;;  %v534_v24 = vadd.f32 %v1667_v55, %v532_v38  ;;  %v714_v33 = vsel %vm19_vm0, %v225_v54, 0.0  ;;  %v253_v55 = vld [vmem:[%s2151_s0 + $0x738] sm:$0xff]  ;;  %v175_v43 = vld [vmem:[%s2151_s0 + $0x4c8] sm:$0xff] }
  0x58   :  { %v658_v19 = vadd.f32 %v657_v49, %v656_v62  ;;  %v768_v28 = vadd.f32 %v767_v59, %v766_v58  ;;  %v601_v21 = vadd.f32 %v600_v41, %v599_v29  ;;  %v661_v13 = vsel %vm19_vm0, %v201_v27, 0.0  ;;  %v254_v49 = vld [vmem:[%s2151_s0 + $0x740] sm:$0xff]  ;;  %v205_v27 = vld [vmem:[%s2151_s0 + $0x5b8] sm:$0xff]  ;;  %v176_v58 = vld [vmem:[%s2151_s0 + $0x4d0] sm:$0xff] }
  0x59   :  { %v713_v20 = vadd.f32 %v712_v63, %v711_v10  ;;  %v771_v34 = vsel %vm19_vm0, %v251_v26, 0.0  ;;  %v602_v38 = vsel %vm19_vm0, %v174_v53, 0.0  ;;  %v716_v1 = vsel %vm19_vm0, %v226_v44, 0.0  ;;  %v230_v53 = vld [vmem:[%s2151_s0 + $0x680] sm:$0xff] }
  0x5a   :  { %v660_v57 = vadd.f32 %v659_v9, %v658_v19  ;;  %v770_v42 = vadd.f32 %v769_v51, %v768_v28  ;;  %v1884_v45 = vadd.f32 %v1487_v3, %v404_v25  ;;  %v663_v6 = vsel %vm19_vm0, %v202_v12, 0.0  ;;  %v229_v25 = vld [vmem:[%s2151_s0 + $0x678] sm:$0xff]  ;;  %v206_v12 = vld [vmem:[%s2151_s0 + $0x5c0] sm:$0xff] }
  0x5b   :  { %v715_v46 = vadd.f32 %v714_v33, %v713_v20  ;;  %v773_v48 = vsel %vm19_vm0, %v252_v2, 0.0  ;;  %v536_v50 = vadd.f32 %v1676_v30, %v534_v24  ;;  %v718_v54 = vsel %vm19_vm0, %v227_v39, 0.0  ;;  %v255_v30 = vld [vmem:[%s2151_s0 + $0x748] sm:$0xff]  ;;  %v256_v2 = vld [vmem:[%s2151_s0 + $0x750] sm:$0xff] }
  0x5c   :  { %v662_v52 = vadd.f32 %v661_v13, %v660_v57  ;;  %v772_v3 = vadd.f32 %v771_v34, %v770_v42  ;;  %v603_v29 = vadd.f32 %v602_v38, %v601_v21  ;;  %v665_v31 = vsel %vm19_vm0, %v203_v35, 0.0  ;;  %v207_v20 = vld [vmem:[%s2151_s0 + $0x5c8] sm:$0xff]  ;;  %v177_v57 = vld [vmem:[%s2151_s0 + $0x4d8] sm:$0xff] }
  0x5d   :  { %v717_v56 = vadd.f32 %v716_v1, %v715_v46  ;;  %v775_v59 = vsel %vm19_vm0, %v253_v55, 0.0  ;;  %v604_v26 = vsel %vm19_vm0, %v175_v43, 0.0  ;;  %v720_v62 = vsel %vm19_vm0, %v228_v15, 0.0  ;;  %v232_v1 = vld [vmem:[%s2151_s0 + $0x690] sm:$0xff] }
  0x5e   :  { %v664_v41 = vadd.f32 %v663_v6, %v662_v52  ;;  %v774_v63 = vadd.f32 %v773_v48, %v772_v3  ;;  %v469_v44 = vadd.f32 %v1564_v14, %v467_v5  ;;  %v667_v9 = vsel %vm19_vm0, %v204_v60, 0.0  ;;  %v231_v14 = vld [vmem:[%s2151_s0 + $0x688] sm:$0xff]  ;;  %v208_v46 = vld [vmem:[%s2151_s0 + $0x5d0] sm:$0xff]  ;;  %v258_v48 = vld [vmem:[%s2151_s0 + $0x760] sm:$0xff] }
  0x5f   :  { %v719_v10 = vadd.f32 %v718_v54, %v717_v56  ;;  %v777_v51 = vsel %vm19_vm0, %v254_v49, 0.0  ;;  %v538_v24 = vadd.f32 %v1679_v32, %v536_v50  ;;  %v722_v33 = vsel %vm19_vm0, %v229_v25, 0.0  ;;  %v257_v32 = vld [vmem:[%s2151_s0 + $0x758] sm:$0xff] }
  0x60   :  { %v666_v19 = vadd.f32 %v665_v31, %v664_v41  ;;  %v776_v28 = vadd.f32 %v775_v59, %v774_v63  ;;  %v605_v5 = vadd.f32 %v604_v26, %v603_v29  ;;  %v669_v39 = vsel %vm19_vm0, %v205_v27, 0.0  ;;  %v209_v31 = vld [vmem:[%s2151_s0 + $0x5d8] sm:$0xff]  ;;  %v178_v26 = vld [vmem:[%s2151_s0 + $0x4e0] sm:$0xff] }
  0x61   :  { %v721_v21 = vadd.f32 %v720_v62, %v719_v10  ;;  %v779_v13 = vsel %vm19_vm0, %v255_v30, 0.0  ;;  %v606_v34 = vsel %vm19_vm0, %v176_v58, 0.0  ;;  %v724_v55 = vsel %vm19_vm0, %v230_v53, 0.0  ;;  %v234_v41 = vld [vmem:[%s2151_s0 + $0x6a0] sm:$0xff] }
  0x62   :  { %v668_v35 = vadd.f32 %v667_v9, %v666_v19  ;;  %v778_v38 = vadd.f32 %v777_v51, %v776_v28  ;;  %v471_v42 = vadd.f32 %v1567_v61, %v469_v44  ;;  %v671_v43 = vsel %vm19_vm0, %v206_v12, 0.0  ;;  %v233_v61 = vld [vmem:[%s2151_s0 + $0x698] sm:$0xff]  ;;  %v260_v44 = vld [vmem:[%s2151_s0 + $0x770] sm:$0xff]  ;;  %v210_v28 = vld [vmem:[%s2151_s0 + $0x5e0] sm:$0xff] }
  0x63   :  { %v723_v15 = vadd.f32 %v722_v33, %v721_v21  ;;  %v781_v6 = vsel %vm19_vm0, %v256_v2, 0.0  ;;  %v540_v60 = vadd.f32 %v1704_v22, %v538_v24  ;;  %v726_v50 = vsel %vm19_vm0, %v231_v14, 0.0  ;;  %v259_v22 = vld [vmem:[%s2151_s0 + $0x768] sm:$0xff] }
  0x64   :  { %v670_v49 = vadd.f32 %v669_v39, %v668_v35  ;;  %v780_v52 = vadd.f32 %v779_v13, %v778_v38  ;;  %v607_v54 = vadd.f32 %v606_v34, %v605_v5  ;;  %v673_v3 = vsel %vm19_vm0, %v207_v20, 0.0  ;;  %v235_v2 = vld [vmem:[%s2151_s0 + $0x6a8] sm:$0xff]  ;;  %v236_v20 = vld [vmem:[%s2151_s0 + $0x6b0] sm:$0xff]  ;;  %v262_v38 = vld [vmem:[%s2151_s0 + $0x780] sm:$0xff] }
  0x65   :  { %v725_v25 = vadd.f32 %v724_v55, %v723_v15  ;;  %v783_v29 = vsel %vm19_vm0, %v257_v32, 0.0  ;;  %v608_v56 = vsel %vm19_vm0, %v177_v57, 0.0  ;;  %v728_v27 = vsel %vm19_vm0, %v232_v1, 0.0  ;;  %v179_v13 = vld [vmem:[%s2151_s0 + $0x4e8] sm:$0xff] }
  0x66   :  { %v672_v59 = vadd.f32 %v671_v43, %v670_v49  ;;  %v782_v30 = vadd.f32 %v781_v6, %v780_v52  ;;  %v473_v62 = vadd.f32 %v1583_v23, %v471_v42  ;;  %v675_v63 = vsel %vm19_vm0, %v208_v46, 0.0  ;;  %v211_v46 = vld [vmem:[%s2151_s0 + $0x5e8] sm:$0xff]  ;;  %v238_v52 = vld [vmem:[%s2151_s0 + $0x6c0] sm:$0xff] }
  0x67   :  { %v727_v58 = vadd.f32 %v726_v50, %v725_v25  ;;  %v785_v53 = vsel %vm19_vm0, %v258_v48, 0.0  ;;  %v542_v9 = vadd.f32 %v1744_v7, %v540_v60  ;;  %v730_v51 = vsel %vm19_vm0, %v233_v61, 0.0  ;;  %v261_v7 = vld [vmem:[%s2151_s0 + $0x778] sm:$0xff]  ;;  %v180_v50 = vld [vmem:[%s2151_s0 + $0x4f0] sm:$0xff] }
  0x68   :  { %v674_v10 = vadd.f32 %v673_v3, %v672_v59  ;;  %v784_v12 = vadd.f32 %v783_v29, %v782_v30  ;;  %v609_v23 = vadd.f32 %v608_v56, %v607_v54  ;;  %v677_v24 = vsel %vm19_vm0, %v209_v31, 0.0  ;;  %v264_v25 = vld [vmem:[%s2151_s0 + $0x790] sm:$0xff]  ;;  %v239_v59 = vld [vmem:[%s2151_s0 + $0x6c8] sm:$0xff] }
  0x69   :  { %v729_v19 = vadd.f32 %v728_v27, %v727_v58  ;;  %v787_v33 = vsel %vm19_vm0, %v259_v22, 0.0  ;;  %v610_v14 = vsel %vm19_vm0, %v178_v26, 0.0  ;;  %v732_v39 = vsel %vm19_vm0, %v234_v41, 0.0  ;;  %v212_v26 = vld [vmem:[%s2151_s0 + $0x5f0] sm:$0xff] }
  0x6a   :  { %v676_v5 = vadd.f32 %v675_v63, %v674_v10  ;;  %v786_v21 = vadd.f32 %v785_v53, %v784_v12  ;;  %v339_v32 = vadd.f32 %v1332_v40, %v1796_v17  ;;  %v475_v34 = vadd.f32 %v1592_v18, %v473_v62  ;;  %v237_v40 = vld [vmem:[%s2151_s0 + $0x6b8] sm:$0xff] }
  0x6b   :  { %v731_v35 = vadd.f32 %v730_v51, %v729_v19  ;;  %v789_v55 = vsel %vm19_vm0, %v260_v44, 0.0  ;;  %v408_v57 = vadd.f32 %v1498_v11, %v1884_v45  ;;  %v734_v42 = vsel %vm19_vm0, %v235_v2, 0.0  ;;  %v263_v11 = vld [vmem:[%s2151_s0 + $0x788] sm:$0xff]  ;;  %v181_v53 = vld [vmem:[%s2151_s0 + $0x4f8] sm:$0xff]  ;;  %v240_v44 = vld [vmem:[%s2151_s0 + $0x6d0] sm:$0xff] }
  0x6c   :  { %v678_v1 = vadd.f32 %v677_v24, %v676_v5  ;;  %v788_v43 = vadd.f32 %v787_v33, %v786_v21  ;;  %v611_v17 = vadd.f32 %v610_v14, %v609_v23  ;;  %v679_v18 = vsel %vm19_vm0, %v210_v28, 0.0  ;;  %v241_v33 = vld [vmem:[%s2151_s0 + $0x6d8] sm:$0xff] }
  0x6d   :  { %v733_v15 = vadd.f32 %v732_v39, %v731_v35  ;;  %v791_v6 = vsel %vm19_vm0, %v261_v7, 0.0  ;;  %v544_v45 = vadd.f32 %v1747_v37, %v542_v9  ;;  %v612_v48 = vsel %vm19_vm0, %v179_v13, 0.0  ;;  %v213_v5 = vld [vmem:[%s2151_s0 + $0x5f8] sm:$0xff]  ;;  %v267_v39 = vld [vmem:[%s2151_s0 + $0x7a8] sm:$0xff] }
  0x6e   :  { %v736_v60 = vsel %vm19_vm0, %v236_v20, 0.0  ;;  %v790_v49 = vadd.f32 %v789_v55, %v788_v43  ;;  %v341_v61 = vadd.f32 %v1342_v47, %v339_v32  ;;  %v477_v54 = vadd.f32 %v1595_v8, %v475_v34  ;;  %v242_v34 = vld [vmem:[%s2151_s0 + $0x6e0] sm:$0xff] }
  0x6f   :  { %v735_v3 = vadd.f32 %v734_v42, %v733_v15  ;;  %v793_v37 = vsel %vm19_vm0, %v262_v38, 0.0  ;;  %v410_v29 = vadd.f32 %v1501_v16, %v408_v57  ;;  %v680_v31 = vadd.f32 %v679_v18, %v678_v1  ;;  %v265_v16 = vld [vmem:[%s2151_s0 + $0x798] sm:$0xff]  ;;  %v268_v1 = vld [vmem:[%s2151_s0 + $0x7b0] sm:$0xff] }
  0x70   :  { %v738_v22 = vsel %vm19_vm0, %v237_v40, 0.0  ;;  %v792_v56 = vadd.f32 %v791_v6, %v790_v49  ;;  %v613_v47 = vadd.f32 %v612_v48, %v611_v17  ;;  %v681_v8 = vsel %vm19_vm0, %v211_v46, 0.0  ;;  %v243_v17 = vld [vmem:[%s2151_s0 + $0x6e8] sm:$0xff]  ;;  %v244_v49 = vld [vmem:[%s2151_s0 + $0x6f0] sm:$0xff] }
  0x71   :  { %v737_v27 = vadd.f32 %v736_v60, %v735_v3  ;;  %v795_v30 = vsel %vm19_vm0, %v263_v11, 0.0  ;;  %v546_v41 = vadd.f32 %v1780_v0, %v544_v45  ;;  %v614_v62 = vsel %vm19_vm0, %v180_v50, 0.0  ;;  %v266_v0 = vld [vmem:[%s2151_s0 + $0x7a0] sm:$0xff]  ;;  %v269_v11 = vld [vmem:[%s2151_s0 + $0x7b8] sm:$0xff] }
  0x72   :  { %v740_v63 = vsel %vm19_vm0, %v238_v52, 0.0  ;;  %v794_v58 = vadd.f32 %v793_v37, %v792_v56  ;;  %v342_v9 = vrot.slane %v341_v61, 4  ;;  %v479_v10 = vadd.f32 %v1611_v36, %v477_v54  ;;  %v270_v3 = vld [vmem:[%s2151_s0 + $0x7c0] sm:$0xff] }
  0x73   :  { %v739_v51 = vadd.f32 %v738_v22, %v737_v27  ;;  %v797_v12 = vsel %vm19_vm0, %v264_v25, 0.0  ;;  %v411_v2 = vrot.slane %v410_v29, 4  ;;  %v682_v23 = vadd.f32 %v681_v8, %v680_v31  ;;  %v245_v22 = vld [vmem:[%s2151_s0 + $0x6f8] sm:$0xff]  ;;  %v271_v8 = vld [vmem:[%s2151_s0 + $0x7c8] sm:$0xff] }
  0x74   :  { %v742_v24 = vsel %vm19_vm0, %v239_v59, 0.0  ;;  %v796_v19 = vadd.f32 %v795_v30, %v794_v58  ;;  %v615_v28 = vadd.f32 %v614_v62, %v613_v47  ;;  %v683_v7 = vsel %vm19_vm0, %v212_v26, 0.0  ;;  %v272_v58 = vld [vmem:[%s2151_s0 + $0x7d0] sm:$0xff] }
  0x75   :  { %v741_v36 = vadd.f32 %v740_v63, %v739_v51  ;;  %v799_v14 = vsel %vm19_vm0, %v265_v16, 0.0  ;;  %v548_v21 = vadd.f32 %v1783_v4, %v546_v41  ;;  %v616_v13 = vsel %vm19_vm0, %v181_v53, 0.0 }
  0x76   :  { %v744_v20 = vsel %vm19_vm0, %v240_v44, 0.0  ;;  %v798_v32 = vadd.f32 %v797_v12, %v796_v19  ;;  %v343_v35 = vadd.f32 %v342_v9, %v341_v61  ;;  %v480_v55 = vrot.slane %v479_v10, 4 }
  0x77   :  { %v743_v38 = vadd.f32 %v742_v24, %v741_v36  ;;  %v801_v57 = vsel %vm19_vm0, %v266_v0, 0.0  ;;  %v412_v42 = vadd.f32 %v411_v2, %v410_v29  ;;  %v684_v4 = vadd.f32 %v683_v7, %v682_v23  ;;  %v273_v2 = vld [vmem:[%s2151_s0 + $0x7d8] sm:$0xff]  ;;  %v274_v7 = vld [vmem:[%s2151_s0 + $0x7e0] sm:$0xff] }
  0x78   :  { %v746_v43 = vsel %vm19_vm0, %v241_v33, 0.0  ;;  %v800_v40 = vadd.f32 %v799_v14, %v798_v32  ;;  %v617_v18 = vadd.f32 %v616_v13, %v615_v28  ;;  %v685_v15 = vsel %vm19_vm0, %v213_v5, 0.0  ;;  %v275_v32 = vld [vmem:[%s2151_s0 + $0x7e8] sm:$0xff] }
  0x79   :  { %v745_v6 = vadd.f32 %v744_v20, %v743_v38  ;;  %v803_v46 = vsel %vm19_vm0, %v267_v39, 0.0  ;;  %v549_v45 = vrot.slane %v548_v21, 4  ;;  %v748_v48 = vsel %vm19_vm0, %v242_v34, 0.0 }
  0x7a   :  { %v802_v60 = vadd.f32 %v801_v57, %v800_v40  ;;  %v344_v50 = vrot.slane %v343_v35, 2  ;;  %v481_v52 = vadd.f32 %v480_v55, %v479_v10  ;;  %v805_v54 = vsel %vm19_vm0, %v268_v1, 0.0  ;;  %v860_v1 = vld [vmem:[%s2152_s1] sm:$0xf] }
  0x7b   :  { %v747_v61 = vadd.f32 %v746_v43, %v745_v6  ;;  %v413_v37 = vrot.slane %v412_v42, 2  ;;  %v686_v25 = vadd.f32 %v685_v15, %v684_v4  ;;  %v750_v29 = vsel %vm19_vm0, %v243_v17, 0.0  ;;  %909 = vmatpush.msk.msra.mxu0 %vm868_vm1, %v860_v1  ;;  %v277_v6 = vld [vmem:[%s2151_s0 + $0x7f8] sm:$0xff] }
  0x7c   :  { %v804_v31 = vadd.f32 %v803_v46, %v802_v60  ;;  %v618_v56 = vrot.slane %v617_v18, 4  ;;  %v807_v47 = vsel %vm19_vm0, %v269_v11, 0.0  ;;  %v550_v27 = vadd.f32 %v549_v45, %v548_v21 }
  0x7d   :  { %v749_v59 = vadd.f32 %v748_v48, %v747_v61  ;;  %v752_v30 = vsel %vm19_vm0, %v244_v49, 0.0  ;;  %v345_v16 = vadd.f32 %v344_v50, %v343_v35  ;;  %v482_v41 = vrot.slane %v481_v52, 2 }
  0x7e   :  { %v806_v26 = vadd.f32 %v805_v54, %v804_v31  ;;  %v809_v63 = vsel %vm19_vm0, %v270_v3, 0.0  ;;  %v414_v53 = vadd.f32 %v413_v37, %v412_v42  ;;  %v687_v44 = vrot.slane %v686_v25, 4  ;;  %v276_v42 = vld [vmem:[%s2151_s0 + $0x7f0] sm:$0xff] }
  0x7f   :  { %v751_v62 = vadd.f32 %v750_v29, %v749_v59  ;;  %v754_v9 = vsel %vm19_vm0, %v245_v22, 0.0  ;;  %v619_v51 = vadd.f32 %v618_v56, %v617_v18  ;;  %v811_v0 = vsel %vm19_vm0, %v271_v8, 0.0 }
  0x80   :  { %v808_v10 = vadd.f32 %v807_v47, %v806_v26  ;;  %v551_v23 = vrot.slane %v550_v27, 2  ;;  %v483_v19 = vadd.f32 %v482_v41, %v481_v52  ;;  %v813_v28 = vsel %vm19_vm0, %v272_v58, 0.0 }
  0x81   :  { %v753_v12 = vadd.f32 %v752_v30, %v751_v62  ;;  %v346_v36 = vrot.slane %v345_v16, 1  ;;  %v415_v14 = vrot.slane %v414_v53, 1  ;;  %v688_v5 = vadd.f32 %v687_v44, %v686_v25  ;;  %v21_v44 = vld [vmem:[#allocation2] sm:$0xff] }
  0x82   :  { %v810_v24 = vadd.f32 %v809_v63, %v808_v10  ;;  %v620_v21 = vrot.slane %v619_v51, 2  ;;  %v815_v20 = vsel %vm19_vm0, %v273_v2, 0.0  ;;  %v552_v34 = vadd.f32 %v551_v23, %v550_v27 }
  0x83   :  { %v755_v33 = vadd.f32 %v754_v9, %v753_v12  ;;  %v484_v55 = vrot.slane %v483_v19, 1  ;;  %v817_v57 = vsel %vm19_vm0, %v274_v7, 0.0  ;;  %v347_v4 = vadd.f32 %v346_v36, %v345_v16 }
  0x84   :  { %v812_v39 = vadd.f32 %v811_v0, %v810_v24  ;;  %v416_v43 = vadd.f32 %v415_v14, %v414_v53  ;;  %v689_v40 = vrot.slane %v688_v5, 2  ;;  %v621_v18 = vadd.f32 %v620_v21, %v619_v51  ;;  %v913_v0 = vld [vmem:[%s2153_s2] ss:$0 sm:$0xff] }
  0x85   :  { %v756_v13 = vrot.slane %v755_v33, 4  ;;  %v819_v15 = vsel %vm19_vm0, %v275_v32, 0.0  ;;  %v553_v46 = vrot.slane %v552_v34, 1  ;;  %v485_v45 = vadd.f32 %v484_v55, %v483_v19 }
  0x86   :  { %v814_v35 = vadd.f32 %v813_v28, %v812_v39  ;;  %v821_v60 = vsel %vm19_vm0, %v276_v42, 0.0  ;;  %v690_v49 = vadd.f32 %v689_v40, %v688_v5  ;;  %v840_v52 = vsel %vm839_vm2, %v416_v43, %v347_v4 }
  0x87   :  { %v757_v38 = vadd.f32 %v756_v13, %v755_v33  ;;  %v622_v61 = vrot.slane %v621_v18, 1  ;;  %v823_v54 = vsel %vm19_vm0, %v277_v6, 0.0  ;;  %v554_v3 = vadd.f32 %v553_v46, %v552_v34 }
  0x88   :  { %v816_v17 = vadd.f32 %v815_v20, %v814_v35  ;;  %v842_v29 = vsel %vm841_vm3, %v485_v45, %v840_v52  ;;  %v691_v31 = vrot.slane %v690_v49, 1  ;;  %vm845_vm5 = vcmask 1044484  }
  0x89   :  { %v758_v48 = vrot.slane %v757_v38, 2  ;;  %v623_v56 = vadd.f32 %v622_v61, %v621_v18  ;;  %v844_v47 = vsel %vm843_vm4, %v554_v3, %v842_v29  ;;  %vm847_vm6 = vcmask 1045509  }
  0x8a   :  { %v818_v11 = vadd.f32 %v817_v57, %v816_v17  ;;  %v692_v27 = vadd.f32 %v691_v31, %v690_v49  ;;  %vm849_vm7 = vcmask 1046534   ;;  %vm851_vm8 = vcmask 1047559  }
  0x8b   :  { %v759_v25 = vadd.f32 %v758_v48, %v757_v38  ;;  %v846_v26 = vsel %vm845_vm5, %v623_v56, %v844_v47 }
  0x8c   :  { %v820_v50 = vadd.f32 %v819_v15, %v818_v11  ;;  %v848_v63 = vsel %vm847_vm6, %v692_v27, %v846_v26 }
  0x8d   :  { %v760_v8 = vrot.slane %v759_v25, 1 }
  0x8e   :  { %v822_v37 = vadd.f32 %v821_v60, %v820_v50 }
  0x8f   :  { %v761_v41 = vadd.f32 %v760_v8, %v759_v25 }
  0x90   :  { %v824_v22 = vadd.f32 %v823_v54, %v822_v37 }
  0x91   :  { %v850_v53 = vsel %vm849_vm7, %v761_v41, %v848_v63 }
  0x92   :  { %v825_v59 = vrot.slane %v824_v22, 4 }
  0x94   :  { %v826_v30 = vadd.f32 %v825_v59, %v824_v22 }
  0x96   :  { %v827_v16 = vrot.slane %v826_v30, 2 }
  0x98   :  { %v828_v62 = vadd.f32 %v827_v16, %v826_v30 }
  0x9a   :  { %v829_v58 = vrot.slane %v828_v62, 1 }
  0x9c   :  { %v830_v9 = vadd.f32 %v829_v58, %v828_v62 }
  0x9e   :  { %v852_v10 = vsel %vm851_vm8, %v830_v9, %v850_v53 }
  0x9f   :  { %v854_v51 = vadd.f32 %v852_v10, %v21_v44 }
  0xa1   :  { %855 = vst.msk [vmem:[#allocation2] sm:$0xff] %vm19_vm0, %v854_v51 }
  0xa8   :  { %v859_v12 = vld [vmem:[#allocation2] sm:$0xff] }
  0xa9   :  { %910 = vmatmul.msk.f32.vlgmr.msra.gmra.mxu0 %vm19_vm0, %v859_v12 }
 0x126   :  { %v889_v2 = vpop.f32.mrf.mxu0 }
 0x127   :  { %v890_v23 = vadd.f32 %v913_v0, %v889_v2 }
 0x129   :  { %892 = vst [vmem:[#allocation3] sm:$0xff] %v890_v23 }
 0x12a   :  { %903 = dma.vmem_to_hbm [thread:$0]  %s899_s14, 128, %s901_s17, [#allocation4]  }
 0x12b   :  { %938 = dma.done.wait [#allocation4], 128  }
 0x12c   :  { %939 = vsyncadd [#allocation4], 4294967168 }
 0x12d   :  { %908 = vsyncpa [#allocation4], 1 }

</bundles_post_ra>
